<compile_context>
chip_gen: v7x
topology: tpu7x:2x2x1
jax: 0.10.0
libtpu: 0.0.40
codegen_flags: <defaults>
</compile_context>

<pallas_src>
import functools

import jax
import jax.numpy as jnp
from jax.experimental import pallas as pl
from jax.experimental.pallas import tpu as pltpu

_MAX_TILE_PIXELS = 65536   # ~1 MiB per 4-channel f32 input block per grid step
_COMPUTE_CHUNK = 1024      # lanes per in-kernel compute chunk (bounds live vregs)


def _attention_kernel(gate_ref, skip_ref, wg_ref, wx_ref, wp_ref, bsum_ref,
                      bp_ref, out_ref, *, chunk):
    # gate_ref: (F_g, tile_p) VMEM     skip_ref: (F_l, tile_p) VMEM
    # wg_ref:  (n_c, F_g) VMEM         wx_ref:  (n_c, F_l) VMEM
    # wp_ref:  (n_c, 1)   VMEM         bsum_ref:(n_c, 1)   VMEM
    # bp_ref:  (1, 1)     VMEM         out_ref: (F_l, tile_p) VMEM
    f32 = jnp.float32
    wg = wg_ref[...].astype(f32)           # hoisted out of the chunk loop
    wx = wx_ref[...].astype(f32)
    wp = wp_ref[...].astype(f32)
    bsum = bsum_ref[...].astype(f32)
    bp = bp_ref[...].astype(f32)

    n_chunks = gate_ref.shape[-1] // chunk

    @pl.loop(0, n_chunks)
    def _(i):
        off = pl.multiple_of(i * chunk, 128)
        g = gate_ref[:, pl.ds(off, chunk)].astype(f32)      # (F_g, chunk)
        s = skip_ref[:, pl.ds(off, chunk)].astype(f32)      # (F_l, chunk)

        # 1x1 convs (+ folded BN) on the MXU; result is sublane-dense (n_c, chunk).
        acc = (jnp.dot(wg, g, preferred_element_type=f32)
               + jnp.dot(wx, s, preferred_element_type=f32)
               + bsum)                                       # (n_c, chunk)
        p = jnp.maximum(acc, 0.0)                            # ReLU

        # psi 1x1 conv: dense multiply + sublane reduce (XLU), then sigmoid.
        z = jnp.sum(p * wp, axis=0, keepdims=True) + bp      # (1, chunk)
        sig = 0.5 * jnp.tanh(0.5 * z) + 0.5                  # sigmoid via EUP tanh

        # Gate the skip connection (psi broadcast over the channel sublanes).
        out_ref[:, pl.ds(off, chunk)] = (s * sig).astype(out_ref.dtype)


def _fold_bn(w, b, gamma, beta, mean, var, eps=1e-5):
    """Fold eval-mode BatchNorm into a 1x1 conv stored as (Cin, Cout)."""
    scale = gamma / jnp.sqrt(var + eps)          # (Cout,)
    w_f = w * scale[None, :]
    b_f = (b - mean) * scale + beta
    return w_f, b_f


def _largest_tile(total, cap):
    """Largest multiple of 128 that divides `total` and is <= cap."""
    best = 128
    d = 128
    hi = min(total, cap)
    while d <= hi:
        if total % d == 0:
            best = d
        d += 128
    return best


@jax.jit
def attention_block(gate, skip, params):
    """gate, skip: NCHW (f32 or bf16). Returns NCHW output = skip * psi."""
    N, F_g, H, W = gate.shape
    _, F_l, _, _ = skip.shape
    HW = H * W

    # Fold eval-mode BN into each 1x1 conv; orient weights for the kernel.
    wg, bg = _fold_bn(params["wg"], params["bg"], *params["bn_g"])
    wx, bx = _fold_bn(params["wx"], params["bx"], *params["bn_x"])
    wp, bp = _fold_bn(params["wp"], params["bp"], *params["bn_p"])
    n_c = wg.shape[1]

    f32 = jnp.float32
    wg_k = wg.T.astype(f32)                         # (n_c, F_g)
    wx_k = wx.T.astype(f32)                         # (n_c, F_l)
    wp_k = wp.astype(f32)                           # (n_c, 1)
    bsum = (bg + bx).astype(f32).reshape(n_c, 1)    # (n_c, 1) folded g1+x1 bias
    bp_k = bp.astype(f32).reshape(1, 1)             # (1, 1)

    # Free reshapes: NCHW -> (N, C, H*W); pad pixel axis to a multiple of 128.
    gate3 = gate.reshape(N, F_g, HW)
    skip3 = skip.reshape(N, F_l, HW)
    hw_pad = ((HW + 127) // 128) * 128
    if hw_pad != HW:
        pad = hw_pad - HW
        gate3 = jnp.pad(gate3, ((0, 0), (0, 0), (0, pad)))
        skip3 = jnp.pad(skip3, ((0, 0), (0, 0), (0, pad)))

    # Pixel tile: as big as the VMEM budget allows; for single-image inputs
    # keep >= 2 pixel steps so both v7x TensorCores get work.
    cap = _MAX_TILE_PIXELS
    if N == 1 and hw_pad >= 256:
        cap = min(cap, (hw_pad // 2 // 128) * 128)
    tile_p = _largest_tile(hw_pad, cap)
    chunk = _largest_tile(tile_p, _COMPUTE_CHUNK)

    grid = (N, hw_pad // tile_p)

    out3 = pl.pallas_call(
        functools.partial(_attention_kernel, chunk=chunk),
        out_shape=jax.ShapeDtypeStruct((N, F_l, hw_pad), skip.dtype),
        grid_spec=pltpu.PrefetchScalarGridSpec(
            num_scalar_prefetch=0,
            grid=grid,
            in_specs=[
                # Lane-dense pixel tiles; batch dim squeezed out of the kernel.
                pl.BlockSpec((None, F_g, tile_p), lambda n, p: (n, 0, p)),
                pl.BlockSpec((None, F_l, tile_p), lambda n, p: (n, 0, p)),
                # Tiny weight / bias blocks, replicated across the grid (VMEM).
                pl.BlockSpec((n_c, F_g), lambda n, p: (0, 0)),
                pl.BlockSpec((n_c, F_l), lambda n, p: (0, 0)),
                pl.BlockSpec((n_c, 1), lambda n, p: (0, 0)),
                pl.BlockSpec((n_c, 1), lambda n, p: (0, 0)),
                pl.BlockSpec((1, 1), lambda n, p: (0, 0)),
            ],
            out_specs=pl.BlockSpec((None, F_l, tile_p), lambda n, p: (n, 0, p)),
        ),
        compiler_params=pltpu.CompilerParams(
            dimension_semantics=("parallel", "parallel"),
            vmem_limit_bytes=32 * 1024 * 1024),
    )(gate3, skip3, wg_k, wx_k, wp_k, bsum, bp_k)

    if hw_pad != HW:
        out3 = out3[:, :, :HW]
    return out3.reshape(N, F_l, H, W)


def _reference(gate, skip, params):
    """Pure-JAX reference of the PyTorch forward (eval-mode BN)."""
    def conv_bn(x, w, b, bn):
        y = jnp.einsum("nchw,co->nohw", x, w) + b[None, :, None, None]
        gamma, beta, mean, var = bn
        y = gamma[None, :, None, None] * (y - mean[None, :, None, None]) / \
            jnp.sqrt(var[None, :, None, None] + 1e-5) + beta[None, :, None, None]
        return y

    g1 = conv_bn(gate, params["wg"], params["bg"], params["bn_g"])
    x1 = conv_bn(skip, params["wx"], params["bx"], params["bn_x"])
    p = jnp.maximum(g1 + x1, 0.0)
    psi = conv_bn(p, params["wp"], params["bp"], params["bn_p"])
    psi = jax.nn.sigmoid(psi)
    return skip * psi


def make_params(key, F_g, F_l, n_coefficients):
    ks = jax.random.split(key, 10)
    f32 = jnp.float32
    params = {
        # conv weights stored as (Cin, Cout)
        "wg": jax.random.normal(ks[0], (F_g, n_coefficients), f32) * 0.2,
        "bg": jax.random.normal(ks[1], (n_coefficients,), f32) * 0.1,
        "wx": jax.random.normal(ks[2], (F_l, n_coefficients), f32) * 0.2,
        "bx": jax.random.normal(ks[3], (n_coefficients,), f32) * 0.1,
        "wp": jax.random.normal(ks[4], (n_coefficients, 1), f32) * 0.2,
        "bp": jax.random.normal(ks[5], (1,), f32) * 0.1,
        # BatchNorm (gamma, beta, running_mean, running_var)
        "bn_g": (jnp.ones((n_coefficients,), f32),
                 jnp.zeros((n_coefficients,), f32),
                 jax.random.normal(ks[6], (n_coefficients,), f32) * 0.05,
                 jnp.ones((n_coefficients,), f32) * 1.1),
        "bn_x": (jnp.ones((n_coefficients,), f32),
                 jnp.zeros((n_coefficients,), f32),
                 jax.random.normal(ks[7], (n_coefficients,), f32) * 0.05,
                 jnp.ones((n_coefficients,), f32) * 0.9),
        "bn_p": (jnp.ones((1,), f32),
                 jnp.zeros((1,), f32),
                 jax.random.normal(ks[8], (1,), f32) * 0.05,
                 jnp.ones((1,), f32) * 1.05),
    }
    return params


if __name__ == "__main__":
    # Small shapes consistent with the module: batch=2, F_g=F_l=4, 16x16, n_coefficients=8.
    N, F_g, F_l, H, W = 2, 4, 4, 16, 16
    n_coefficients = 8

    key = jax.random.PRNGKey(0)
    k_gate, k_skip, k_params = jax.random.split(key, 3)
    gate = jax.random.normal(k_gate, (N, F_g, H, W), jnp.float32)
    skip = jax.random.normal(k_skip, (N, F_l, H, W), jnp.float32)
    params = make_params(k_params, F_g, F_l, n_coefficients)

    out = attention_block(gate, skip, params)
    out = jax.block_until_ready(out)

    ref = _reference(gate, skip, params)
    assert out.shape == (N, F_l, H, W)
    assert jnp.allclose(out, ref, atol=1e-5, rtol=1e-5), \
        f"max abs err = {jnp.max(jnp.abs(out - ref))}"

    print("KERNEL_OK")
</pallas_src>

<mosaic_0001>
module attributes {stable_mosaic.version = 11 : i64} {
  func.func @_attention_kernel(%arg0: i32, %arg1: i32, %arg2: memref<1x4x256xf32, #tpu.memory_space<vmem>>, %arg3: memref<1x4x256xf32, #tpu.memory_space<vmem>>, %arg4: memref<8x4xf32, #tpu.memory_space<vmem>>, %arg5: memref<8x4xf32, #tpu.memory_space<vmem>>, %arg6: memref<8x1xf32, #tpu.memory_space<vmem>>, %arg7: memref<8x1xf32, #tpu.memory_space<vmem>>, %arg8: memref<1x1xf32, #tpu.memory_space<vmem>>, %arg9: memref<1x4x256xf32, #tpu.memory_space<vmem>>) attributes {dimension_semantics = [#tpu.dimension_semantics<parallel>, #tpu.dimension_semantics<parallel>], iteration_bounds = array<i64: 2, 1>, scalar_prefetch = 0 : i64, scratch_operands = 0 : i64, tpu.core_type = #tpu.core_type<tc>, window_params = [{transform_indices = @transform_0, window_bounds = array<i64: 1, 4, 256>}, {transform_indices = @transform_1, window_bounds = array<i64: 1, 4, 256>}, {pipeline_mode = #tpu.pipeline_mode<synchronous>, transform_indices = @transform_2, window_bounds = array<i64: 8, 4>}, {pipeline_mode = #tpu.pipeline_mode<synchronous>, transform_indices = @transform_3, window_bounds = array<i64: 8, 4>}, {pipeline_mode = #tpu.pipeline_mode<synchronous>, transform_indices = @transform_4, window_bounds = array<i64: 8, 1>}, {pipeline_mode = #tpu.pipeline_mode<synchronous>, transform_indices = @transform_5, window_bounds = array<i64: 8, 1>}, {pipeline_mode = #tpu.pipeline_mode<synchronous>, transform_indices = @transform_6, window_bounds = array<i64: 1, 1>}, {transform_indices = @transform_7, window_bounds = array<i64: 1, 4, 256>}]} {
    %c0 = arith.constant 0 : index
    %c0_0 = arith.constant 0 : index
    %0 = vector.load %arg4[%c0, %c0_0] : memref<8x4xf32, #tpu.memory_space<vmem>>, vector<8x4xf32>
    %c0_1 = arith.constant 0 : index
    %c0_2 = arith.constant 0 : index
    %1 = vector.load %arg5[%c0_1, %c0_2] : memref<8x4xf32, #tpu.memory_space<vmem>>, vector<8x4xf32>
    %c0_3 = arith.constant 0 : index
    %c0_4 = arith.constant 0 : index
    %2 = vector.load %arg6[%c0_3, %c0_4] : memref<8x1xf32, #tpu.memory_space<vmem>>, vector<8x1xf32>
    %c0_5 = arith.constant 0 : index
    %c0_6 = arith.constant 0 : index
    %3 = vector.load %arg7[%c0_5, %c0_6] : memref<8x1xf32, #tpu.memory_space<vmem>>, vector<8x1xf32>
    %c0_7 = arith.constant 0 : index
    %c0_8 = arith.constant 0 : index
    %4 = vector.load %arg8[%c0_7, %c0_8] : memref<1x1xf32, #tpu.memory_space<vmem>>, vector<1x1xf32>
    %c0_i32 = arith.constant 0 : i32
    %c1_i32 = arith.constant 1 : i32
    %5 = arith.muli %c0_i32, %c1_i32 : i32
    %c0_i32_9 = arith.constant 0 : i32
    %6 = arith.addi %c0_i32_9, %5 : i32
    %c256_i32 = arith.constant 256 : i32
    %7 = arith.muli %6, %c256_i32 : i32
    %8 = tpu.assume_multiple %7, 128 : i32
    %c0_10 = arith.constant 0 : index
    %c0_11 = arith.constant 0 : index
    %9 = arith.index_cast %8 : i32 to index
    %10 = vector.load %arg2[%c0_10, %c0_11, %9] : memref<1x4x256xf32, #tpu.memory_space<vmem>>, vector<1x4x256xf32>
    %11 = vector.shape_cast %10 : vector<1x4x256xf32> to vector<4x256xf32>
    %c0_12 = arith.constant 0 : index
    %c0_13 = arith.constant 0 : index
    %12 = arith.index_cast %8 : i32 to index
    %13 = vector.load %arg3[%c0_12, %c0_13, %12] : memref<1x4x256xf32, #tpu.memory_space<vmem>>, vector<1x4x256xf32>
    %14 = vector.shape_cast %13 : vector<1x4x256xf32> to vector<4x256xf32>
    %cst = arith.constant dense<0.000000e+00> : vector<8x256xf32>
    %15 = tpu.matmul %0, %11, %cst {dimension_numbers = #tpu.dot_dimension_numbers<[1], [0], [0], [1], [0, 0, 1, 1], [], []>} : vector<8x4xf32>, vector<4x256xf32>, vector<8x256xf32> -> vector<8x256xf32>
    %cst_14 = arith.constant dense<0.000000e+00> : vector<8x256xf32>
    %16 = tpu.matmul %1, %14, %cst_14 {dimension_numbers = #tpu.dot_dimension_numbers<[1], [0], [0], [1], [0, 0, 1, 1], [], []>} : vector<8x4xf32>, vector<4x256xf32>, vector<8x256xf32> -> vector<8x256xf32>
    %17 = arith.addf %15, %16 : vector<8x256xf32>
    %18 = vector.broadcast %3 : vector<8x1xf32> to vector<8x256xf32>
    %19 = arith.addf %17, %18 : vector<8x256xf32>
    %cst_15 = arith.constant 0.000000e+00 : f32
    %20 = vector.broadcast %cst_15 : f32 to vector<8x256xf32>
    %21 = arith.maximumf %19, %20 : vector<8x256xf32>
    %22 = vector.broadcast %2 : vector<8x1xf32> to vector<8x256xf32>
    %23 = arith.mulf %21, %22 : vector<8x256xf32>
    %cst_16 = arith.constant dense<0.000000e+00> : vector<256xf32>
    %24 = vector.multi_reduction <add>, %23, %cst_16 [0] : vector<8x256xf32> to vector<256xf32>
    %25 = vector.shape_cast %24 : vector<256xf32> to vector<1x256xf32>
    %26 = vector.broadcast %4 : vector<1x1xf32> to vector<1x256xf32>
    %27 = arith.addf %25, %26 : vector<1x256xf32>
    %cst_17 = arith.constant 5.000000e-01 : f32
    %28 = vector.broadcast %cst_17 : f32 to vector<1x256xf32>
    %29 = arith.mulf %28, %27 : vector<1x256xf32>
    %30 = math.tanh %29 : vector<1x256xf32>
    %cst_18 = arith.constant 5.000000e-01 : f32
    %31 = vector.broadcast %cst_18 : f32 to vector<1x256xf32>
    %32 = arith.mulf %31, %30 : vector<1x256xf32>
    %cst_19 = arith.constant 5.000000e-01 : f32
    %33 = vector.broadcast %cst_19 : f32 to vector<1x256xf32>
    %34 = arith.addf %32, %33 : vector<1x256xf32>
    %35 = vector.broadcast %34 : vector<1x256xf32> to vector<4x256xf32>
    %36 = arith.mulf %14, %35 : vector<4x256xf32>
    %c0_20 = arith.constant 0 : index
    %c0_21 = arith.constant 0 : index
    %37 = arith.index_cast %8 : i32 to index
    %38 = vector.load %arg9[%c0_20, %c0_21, %37] : memref<1x4x256xf32, #tpu.memory_space<vmem>>, vector<1x4x256xf32>
    %39 = vector.shape_cast %38 : vector<1x4x256xf32> to vector<4x256xf32>
    %40 = vector.shape_cast %36 : vector<4x256xf32> to vector<1x4x256xf32>
    tpu.vector_store %arg9[%c0_20, %c0_21, %37], %40 {strides = array<i32>} : memref<1x4x256xf32, #tpu.memory_space<vmem>>, vector<1x4x256xf32>,
    %c1_i32_22 = arith.constant 1 : i32
    return
  }
  func.func @transform_0(%arg0: i32, %arg1: i32) -> (i32, i32, i32) {
    %c0_i32 = arith.constant 0 : i32
    %c0_i32_0 = arith.constant 0 : i32
    return %arg0, %c0_i32, %arg1 : i32, i32, i32
  }
  func.func @transform_1(%arg0: i32, %arg1: i32) -> (i32, i32, i32) {
    %c0_i32 = arith.constant 0 : i32
    %c0_i32_0 = arith.constant 0 : i32
    return %arg0, %c0_i32, %arg1 : i32, i32, i32
  }
  func.func @transform_2(%arg0: i32, %arg1: i32) -> (i32, i32) {
    %c0_i32 = arith.constant 0 : i32
    %c0_i32_0 = arith.constant 0 : i32
    %c0_i32_1 = arith.constant 0 : i32
    return %c0_i32, %c0_i32_0 : i32, i32
  }
  func.func @transform_3(%arg0: i32, %arg1: i32) -> (i32, i32) {
    %c0_i32 = arith.constant 0 : i32
    %c0_i32_0 = arith.constant 0 : i32
    %c0_i32_1 = arith.constant 0 : i32
    return %c0_i32, %c0_i32_0 : i32, i32
  }
  func.func @transform_4(%arg0: i32, %arg1: i32) -> (i32, i32) {
    %c0_i32 = arith.constant 0 : i32
    %c0_i32_0 = arith.constant 0 : i32
    %c0_i32_1 = arith.constant 0 : i32
    return %c0_i32, %c0_i32_0 : i32, i32
  }
  func.func @transform_5(%arg0: i32, %arg1: i32) -> (i32, i32) {
    %c0_i32 = arith.constant 0 : i32
    %c0_i32_0 = arith.constant 0 : i32
    %c0_i32_1 = arith.constant 0 : i32
    return %c0_i32, %c0_i32_0 : i32, i32
  }
  func.func @transform_6(%arg0: i32, %arg1: i32) -> (i32, i32) {
    %c0_i32 = arith.constant 0 : i32
    %c0_i32_0 = arith.constant 0 : i32
    %c0_i32_1 = arith.constant 0 : i32
    return %c0_i32, %c0_i32_0 : i32, i32
  }
  func.func @transform_7(%arg0: i32, %arg1: i32) -> (i32, i32, i32) {
    %c0_i32 = arith.constant 0 : i32
    %c0_i32_0 = arith.constant 0 : i32
    return %arg0, %c0_i32, %arg1 : i32, i32, i32
  }
}

</mosaic_0001>

<bundles_post_ra>
// kernel: attention_block.1
= control target key start
LH: loop header
LB: loop body
LE: loop exit
PB: predicated region body
PF: predicated region fallthrough
CT: control target
= control target key end

     0   :  { %s810_s26 = smov 0   ;;  %s812_s27 = smov 0   ;;  %s863_s0 = inlined_call_operand.vmem [shape: f32[2,4,256], index: 0, kind: input, shape index: {}]   ;;  %s864_s1 = inlined_call_operand.vmem [shape: f32[2,4,256], index: 1, kind: input, shape index: {}]   ;;  %s865_s2 = inlined_call_operand.vmem [shape: f32[8,4], index: 2, kind: input, shape index: {}]   ;;  %s866_s3 = inlined_call_operand.vmem [shape: f32[8,4], index: 3, kind: input, shape index: {}]   ;;  %s867_s4 = inlined_call_operand.vmem [shape: f32[8,1], index: 4, kind: input, shape index: {}]   ;;  %s868_s5 = inlined_call_operand.vmem [shape: f32[8,1], index: 5, kind: input, shape index: {}]   ;;  %s869_s6 = inlined_call_operand.<no memory space> [shape: f32[1,1], index: 6, kind: input, shape index: {}]   ;;  %s870_s7 = inlined_call_operand.vmem [shape: f32[2,4,256], index: 7, kind: output, shape index: {}]  }
   0x1   :  { %v12_v0 = vstv %s869_s6  ;;  %s814_s28 = smov 0  }
   0x2   :  { %13 = vst [vmem:[#allocation2] sm:$0x1] %v12_v0 }
   0x3 LB: > { %s31_s6 = sadd.s32 1, %s759_s27  ;;  %p687_p0 = scmp.ge.s32.totalorder %s763_s28, 1  ;;  %s763_s28 = sphi %s814_s28, %s19_s28   ;;  %s759_s27 = sphi %s812_s27, %s872_s27   ;;  %s755_s26 = sphi %s810_s26, %s871_s26  }
   0x4   : > { %p33_p1 = scmp.ge.s32.totalorder %s31_s6, 2  ;;  %p277_p2 = scmp.lt.s32.totalorder %s763_s28, 3 }
   0x6   : > { %s874_s6 = smov (%p33_p1, %s31_s6), 0  ;;  %p278_p3 = pnand %p687_p0, %p277_p2 }
   0x7   : > { %p327_p4 = scmp.lt.s32.totalorder (!%p278_p3), %s755_s26, 1  ;;  %v765_v1 = vmov (!%p278_p3), 0.0   ;;  %v359_v2 = vld [vmem:[%s868_s5] sm:$0xff] (!%p278_p3)  ;;  %v766_v4 = vmov (!%p278_p3), 0   ;;  %vm369_vm0 = vcmask (!%p278_p3), 1043456   ;;  %vm365_vm1 = vcmask (!%p278_p3), 31744  }
   0x8   : > { %281 = sbr.rel (%p278_p3) target bundleno = 281 (0x119), region = 48  ;;  %438 = vmatprep.mubr.f32.mxu1 (!%p278_p3), %v765_v1  ;;  %518 = vmatprep.mubr.f32.mxu0 (!%p278_p3), %v765_v1  ;;  %v358_v5 = vld [vmem:[%s867_s4] sm:$0xff] (!%p278_p3)  ;;  %v558_v22 = vlaneseq (!%p278_p3) }
   0x9   : > { %v360_v3 = vld [vmem:[#allocation2] sm:$0x1] (!%p278_p3)  ;;  %733 = vset.pattern.permute.xlu0 (!%p278_p3), %v766_v4  ;;  %734 = vset.pattern.permute.xlu1 (!%p278_p3), %v766_v4 }
   0xa   : > { %527 = vperm.xlu0 (!%p278_p3), %733, %v359_v2   ;;  %555 = vperm.xlu1 (!%p278_p3), %734, %v360_v3   ;;  %v357_v10 = vld [vmem:[%s866_s3] sm:$0xff] (!%p278_p3)  ;;  %v559_v28 = vshrl.u32 (!%p278_p3), %v558_v22, 7 }
   0xb   : > { %v356_v11 = vld [vmem:[%s865_s2] sm:$0xff] (!%p278_p3) }
   0xc   : > { %v560_v33 = vsub.s32 (!%p278_p3), 0, %v559_v28 }
   0xe   : > { %536 = vperm.xlu0 (!%p278_p3), %733, %v358_v5  }
   0xf   : > { %s876_s26 = smov (!%p327_p4, %s755_s26), 1 }
  0x10   : > { %s831_s8 = sshll.u32 %s876_s26, 3 }
  0x11   : > { %s344_s13 = scalar_lea.vmem %s864_s1, %s831_s8  ;;  %s334_s16 = scalar_lea.vmem %s863_s0, %s831_s8 }
  0x12   : > { %v362_v6 = vld [vmem:[%s344_s13] sm:$0xff]  ;;  %s354_s23 = scalar_lea.vmem %s870_s7, %s831_s8 }
  0x13   : > { %v364_v7 = vcombine.high %v362_v6, %v362_v6  ;;  %v361_v8 = vld [vmem:[%s334_s16] sm:$0xff] }
  0x14   : > { %v446_v9 = vcombine.high %v361_v8, %v361_v8 }
  0x15   : > { %694 = vmatprep.subr.msk.mxu1 %vm369_vm0, %v364_v7 }
  0x16   : > { %697 = vmatprep.subr.msk.mxu0 %vm369_vm0, %v446_v9  ;;  %695 = vmatpush1.msk.msra.mxu1 %vm369_vm0, %v362_v6 }
  0x17   : > { %698 = vmatpush1.msk.msra.mxu0 %vm369_vm0, %v361_v8  ;;  %696 = vmatmul.mubr.msk.f32.vlgmr.msra.gmra.mrb[0].mxu1 %vm365_vm1, %v357_v10 }
  0x18   : > { %699 = vmatmul.mubr.msk.f32.vlgmr.msra.gmra.mrb[0].mxu0 %vm365_vm1, %v356_v11 }
  0x89   : > { %v528_v12 = vpop.permute.xlu0 %527  ;;  %v556_v35 = vpop.permute.xlu1 %555 }
  0x8a   : > { %v561_v39 = vrot.slane %v556_v35, %v560_v33 }
  0x8d   : > { %v537_v23 = vpop.permute.xlu0 %536 }
  0xea   : > { %v440_v13 = vpop.f32.mrb[0].mxu1 }
  0xeb   : > { %v520_v14 = vpop.f32.mrb[0].mxu0  ;;  %v442_v15 = vpop.f32.mrb[1].mxu1 }
  0xec   : > { %v521_v16 = vadd.f32 %v520_v14, %v440_v13  ;;  %v522_v17 = vpop.f32.mrb[1].mxu0 }
  0xed   : > { %v523_v18 = vadd.f32 %v522_v17, %v442_v15 }
  0xee   : > { %v530_v19 = vadd.f32 %v528_v12, %v521_v16 }
  0xef   : > { %v531_v20 = vadd.f32 %v528_v12, %v523_v18 }
  0xf0   : > { %v532_v21 = vmax.f32 %v530_v19, 0.0 }
  0xf1   : > { %v533_v24 = vmax.f32 %v531_v20, 0.0 }
  0xf2   : > { %v539_v25 = vmul.f32 %v537_v23, %v532_v21 }
  0xf3   : > { %v540_v26 = vmul.f32 %v537_v23, %v533_v24 }
  0xf4   : > { %v541_v27 = vrot.slane %v539_v25, 4 }
  0xf5   : > { %v547_v29 = vrot.slane %v540_v26, 4 }
  0xf6   : > { %v542_v30 = vadd.f32 %v541_v27, %v539_v25 }
  0xf7   : > { %v548_v31 = vadd.f32 %v547_v29, %v540_v26 }
  0xf8   : > { %v543_v32 = vrot.slane %v542_v30, 2 }
  0xf9   : > { %v549_v34 = vrot.slane %v548_v31, 2 }
  0xfa   : > { %v544_v36 = vadd.f32 %v543_v32, %v542_v30 }
  0xfb   : > { %v550_v37 = vadd.f32 %v549_v34, %v548_v31 }
  0xfc   : > { %v545_v38 = vrot.slane %v544_v36, 1 }
  0xfd   : > { %v551_v40 = vrot.slane %v550_v37, 1 }
  0xfe   : > { %v546_v41 = vadd.f32 %v545_v38, %v544_v36 }
  0xff   : > { %v552_v42 = vadd.f32 %v551_v40, %v550_v37 }
 0x100   : > { %v562_v43 = vadd.f32 %v561_v39, %v546_v41 }
 0x101   : > { %v563_v44 = vadd.f32 %v561_v39, %v552_v42 }
 0x102   : > { %v564_v45 = vmul.f32 0.5, %v562_v43 }
 0x103   : > { %v565_v46 = vmul.f32 0.5, %v563_v44 }
 0x104   : > { %737 = vtanh.f32 %v564_v45 }
 0x105   : > { %739 = vtanh.f32 %v565_v46 }
 0x10e   : > { %v738_v47 = vpop.eup %737 }
 0x10f   : > { %v740_v48 = vpop.eup %739  ;;  %v568_v49 = vmul.f32 0.5, %v738_v47 }
 0x110   : > { %v569_v50 = vmul.f32 0.5, %v740_v48 }
 0x111   : > { %v570_v51 = vadd.f32 0.5, %v568_v49 }
 0x112   : > { %v571_v52 = vadd.f32 0.5, %v569_v50 }
 0x114   : > { %v574_v53 = vcombine.low %v570_v51, %v571_v52 }
 0x116   : > { %v576_v54 = vmul.f32 %v574_v53, %v362_v6 }
 0x118   : > { %577 = vst [vmem:[%s354_s23] sm:$0xff] %v576_v54 }
 0x119 PF: > { %s19_s28 = sadd.s32 1, %s763_s28   ;;  %s871_s26 = smov %s759_s27 }
 0x11a   : > { %p16_p5 = scmp.ge.s32.totalorder %s19_s28, 4   ;;  %s872_s27 = smov %s874_s6 }
 0x11c   :  { %18 = sbr.rel (!%p16_p5) target bundleno = 3 (0x3), region = 81 }

</bundles_post_ra>
